<compile_context>
chip_gen: v6e
topology: v6e:2x2x1
jax: 0.10.0
libtpu: 0.0.40
codegen_flags: <defaults>
</compile_context>

<pallas_src>
import functools
import math

import jax
import jax.numpy as jnp
from jax import lax
from jax.experimental import pallas as pl
from jax.experimental.pallas import tpu as pltpu

_LANE = 128
_SUBLANE = 8


def _round_up(x, m):
    return ((x + m - 1) // m) * m


def _gesn_kernel(x_ref, lbd_ref, win_ref, what_ref, out_ref, *, n_iters: int):
    """One grid step == one tile of Bt graphs.

    x_ref    : (Bt, Np, Fp)       zero-padded node features
    lbd_ref  : (1, Bt*Np, Bt*Np)  block-diagonal sym-normalized Laplacian
    win_ref  : (Fp, Hp)           input weights (zero-padded)
    what_ref : (Hp, Hp)           recurrent reservoir weights (zero-padded)
    out_ref  : (1, Bt, Hp)        per-graph node-summed reservoir states
    """
    bt, np_, fp = x_ref.shape
    hp = what_ref.shape[1]
    bn = bt * np_

    x = x_ref[...]                         # f32, no redundant casts
    l_bd = lbd_ref[0]                      # (bn, bn), loop-invariant
    w_in = win_ref[...]
    w_hat = what_ref[...]

    # Loop-invariant input drive: one (Bt*Np, Fp) @ (Fp, Hp) matmul.
    x_in = jnp.dot(x.reshape(bn, fp), w_in,
                   preferred_element_type=jnp.float32)          # (bn, Hp)

    h0 = jnp.zeros((bn, hp), jnp.float32)                       # reset_hidden()

    def body(_, h):
        # Diffusion over ALL Bt graphs at once (block-diagonal L): one big
        # MXU matmul instead of Bt tiny ones.
        lh = jnp.dot(l_bd, h, preferred_element_type=jnp.float32)      # (bn, Hp)
        rec = jnp.dot(lh, w_hat, preferred_element_type=jnp.float32)   # (bn, Hp)
        return jnp.tanh(x_in + rec)        # tanh -> EUP, free bundle slot

    h = lax.fori_loop(0, n_iters, body, h0, unroll=True)

    # aggregator: SUM over nodes; mean normalization + readout hoisted to XLA.
    out_ref[0] = jnp.sum(h.reshape(bt, np_, hp), axis=1)


def gesn_pool_forward(x, lap, w_in, w_hat, w_ro, b_ro, *, n_iters=8,
                      node_counts=None, block_b=None):
    """x: [B, N, F]; lap: [B, N, N]; w_in: [F, H]; w_hat: [H, H];
       w_ro: [H, C]; b_ro: [1, C]  ->  [B, C]."""
    B, N, F = x.shape
    H = w_in.shape[1]

    # ---- lane / sublane friendly zero padding -------------------------------
    Fp = _round_up(F, _LANE)
    Hp = _round_up(H, _LANE)
    Np = _round_up(N, _SUBLANE)

    x_p = jnp.pad(x.astype(jnp.float32),
                  ((0, 0), (0, Np - N), (0, Fp - F)))
    lap_p = jnp.pad(lap.astype(jnp.float32),
                    ((0, 0), (0, Np - N), (0, Np - N)))
    w_in_p = jnp.pad(w_in.astype(jnp.float32), ((0, Fp - F), (0, Hp - H)))
    w_hat_p = jnp.pad(w_hat.astype(jnp.float32), ((0, Hp - H), (0, Hp - H)))
    # TODO(synk): on v6e/v7x the Laplacian + X can be fed to the MXU in bf16
    # (f32 accumulation) to halve HBM traffic; kept f32 for tight numerics.

    # ---- batch tiling: Bt graphs per grid step ------------------------------
    if block_b is None:
        # Target Bt*Np in the 128..512 range: big MXU M-dim, modest VMEM.
        cap = max(1, 512 // Np)
        block_b = 1
        for d in range(1, min(B, cap) + 1):
            if B % d == 0:
                block_b = d
    assert B % block_b == 0, "batch must be divisible by the graph tile"
    n_blocks = B // block_b
    bn = block_b * Np

    # ---- block-diagonal Laplacian per batch tile (cheap XLA glue) -----------
    # l_bd[g, a*Np+i, b*Np+j] = lap[g, a, i, j] * (a == b)
    lap_g = lap_p.reshape(n_blocks, block_b, Np, Np)
    eye_b = jnp.eye(block_b, dtype=jnp.float32)
    lap_bd = jnp.einsum('gaij,ab->gaibj', lap_g, eye_b).reshape(n_blocks, bn, bn)

    cost = pl.CostEstimate(
        flops=n_blocks * (2 * bn * Fp * Hp
                          + n_iters * (2 * bn * bn * Hp + 2 * bn * Hp * Hp)),
        transcendentals=n_blocks * n_iters * bn * Hp,
        bytes_accessed=4 * (B * Np * Fp + n_blocks * bn * bn
                            + Fp * Hp + Hp * Hp + B * Hp))

    kernel = functools.partial(_gesn_kernel, n_iters=n_iters)

    pooled_sum = pl.pallas_call(
        kernel,
        out_shape=jax.ShapeDtypeStruct((n_blocks, block_b, Hp), jnp.float32),
        grid_spec=pltpu.PrefetchScalarGridSpec(
            num_scalar_prefetch=0,
            grid=(n_blocks,),
            in_specs=[
                pl.BlockSpec((block_b, Np, Fp), lambda g: (g, 0, 0)),  # X tile
                pl.BlockSpec((1, bn, bn), lambda g: (g, 0, 0)),        # L blockdiag
                pl.BlockSpec((Fp, Hp), lambda g: (0, 0)),              # W_in
                pl.BlockSpec((Hp, Hp), lambda g: (0, 0)),              # W_hat
            ],
            out_specs=pl.BlockSpec((1, block_b, Hp), lambda g: (g, 0, 0)),
        ),
        compiler_params=pltpu.CompilerParams(
            dimension_semantics=("parallel",)),
        cost_estimate=cost,
    )(x_p, lap_bd, w_in_p, w_hat_p)

    pooled_sum = pooled_sum.reshape(B, Hp)[:, :H]        # drop lane padding

    # aggregator normalization by the TRUE node count of each graph (padded
    # node rows contribute exactly zero to the in-kernel sum).
    if node_counts is None:
        node_counts = jnp.full((B,), N, jnp.float32)
    feat = pooled_sum / node_counts.astype(jnp.float32)[:, None]

    # readout.predict: one batched XLA matmul instead of B tiny M=1 MXU calls.
    return feat @ w_ro.astype(jnp.float32) + b_ro.astype(jnp.float32)


def _reference(x, lap, w_in, w_hat, w_ro, b_ro, n_iters=8):
    """Pure-JAX reference of the same forward pass (for sanity)."""
    def per_graph(xg, lg):
        x_in = xg @ w_in
        h = jnp.zeros((xg.shape[0], w_in.shape[1]), jnp.float32)
        for _ in range(n_iters):
            h = jnp.tanh(x_in + (lg @ h) @ w_hat)
        feat = jnp.mean(h, axis=0)
        return feat @ w_ro + b_ro[0]
    return jax.vmap(per_graph)(x, lap)


def _make_sym_normalized_laplacian(key, B, N):
    """L = I - D^{-1/2} A D^{-1/2} for a random undirected adjacency."""
    a = jax.random.bernoulli(key, p=0.3, shape=(B, N, N)).astype(jnp.float32)
    a = jnp.triu(a, k=1)
    a = a + jnp.swapaxes(a, -1, -2)                      # symmetric, zero diag
    deg = jnp.sum(a, axis=-1)                            # [B, N]
    d_inv_sqrt = jnp.where(deg > 0, 1.0 / jnp.sqrt(jnp.maximum(deg, 1e-12)), 0.0)
    norm_a = a * d_inv_sqrt[:, :, None] * d_inv_sqrt[:, None, :]
    eye = jnp.eye(N, dtype=jnp.float32)[None]
    return eye - norm_a


if __name__ == "__main__":
    # Small, forward-consistent shapes: batch of 2 graphs, 16 nodes each,
    # 4 input node features, hidden (reservoir) size 32, 4 readout classes.
    B, N, F, H, C = 2, 16, 4, 32, 4
    n_iters = 8

    key = jax.random.PRNGKey(0)
    k_x, k_adj, k_win, k_what, k_wro, k_bro = jax.random.split(key, 6)

    x = jax.random.normal(k_x, (B, N, F), dtype=jnp.float32)
    lap = _make_sym_normalized_laplacian(k_adj, B, N)

    # Deterministic synthetic reservoir / readout parameters.
    w_in = jax.random.normal(k_win, (F, H), dtype=jnp.float32) * 0.5
    w_hat = jax.random.normal(k_what, (H, H), dtype=jnp.float32) * (0.9 / jnp.sqrt(H))
    w_ro = jax.random.normal(k_wro, (H, C), dtype=jnp.float32) * 0.1
    b_ro = jax.random.normal(k_bro, (1, C), dtype=jnp.float32) * 0.01

    out = gesn_pool_forward(x, lap, w_in, w_hat, w_ro, b_ro, n_iters=n_iters)
    out = jax.block_until_ready(out)

    ref = _reference(x, lap, w_in, w_hat, w_ro, b_ro, n_iters=n_iters)
    assert out.shape == (B, C)
    assert jnp.allclose(out, ref, atol=1e-4, rtol=1e-4), (out, ref)

    print("KERNEL_OK")
</pallas_src>

<mosaic_0001>
module attributes {stable_mosaic.version = 11 : i64} {
  func.func @_gesn_kernel(%arg0: i32, %arg1: memref<2x16x128xf32, #tpu.memory_space<vmem>>, %arg2: memref<1x32x32xf32, #tpu.memory_space<vmem>>, %arg3: memref<128x128xf32, #tpu.memory_space<vmem>>, %arg4: memref<128x128xf32, #tpu.memory_space<vmem>>, %arg5: memref<1x2x128xf32, #tpu.memory_space<vmem>>) attributes {dimension_semantics = [#tpu.dimension_semantics<parallel>], iteration_bounds = array<i64: 1>, scalar_prefetch = 0 : i64, scratch_operands = 0 : i64, tpu.core_type = #tpu.core_type<tc>, window_params = [{transform_indices = @transform_0, window_bounds = array<i64: 2, 16, 128>}, {transform_indices = @transform_1, window_bounds = array<i64: 1, 32, 32>}, {pipeline_mode = #tpu.pipeline_mode<synchronous>, transform_indices = @transform_2, window_bounds = array<i64: 128, 128>}, {pipeline_mode = #tpu.pipeline_mode<synchronous>, transform_indices = @transform_3, window_bounds = array<i64: 128, 128>}, {transform_indices = @transform_4, window_bounds = array<i64: 1, 2, 128>}]} {
    %c0 = arith.constant 0 : index
    %c0_0 = arith.constant 0 : index
    %c0_1 = arith.constant 0 : index
    %0 = vector.load %arg1[%c0, %c0_0, %c0_1] : memref<2x16x128xf32, #tpu.memory_space<vmem>>, vector<2x16x128xf32>
    %c0_2 = arith.constant 0 : index
    %c0_3 = arith.constant 0 : index
    %c0_4 = arith.constant 0 : index
    %1 = vector.load %arg2[%c0_2, %c0_3, %c0_4] : memref<1x32x32xf32, #tpu.memory_space<vmem>>, vector<1x32x32xf32>
    %2 = vector.shape_cast %1 : vector<1x32x32xf32> to vector<32x32xf32>
    %c0_5 = arith.constant 0 : index
    %c0_6 = arith.constant 0 : index
    %3 = vector.load %arg3[%c0_5, %c0_6] : memref<128x128xf32, #tpu.memory_space<vmem>>, vector<128x128xf32>
    %c0_7 = arith.constant 0 : index
    %c0_8 = arith.constant 0 : index
    %4 = vector.load %arg4[%c0_7, %c0_8] : memref<128x128xf32, #tpu.memory_space<vmem>>, vector<128x128xf32>
    %5 = vector.shape_cast %0 : vector<2x16x128xf32> to vector<32x128xf32>
    %cst = arith.constant dense<0.000000e+00> : vector<32x128xf32>
    %6 = tpu.matmul %5, %3, %cst {dimension_numbers = #tpu.dot_dimension_numbers<[1], [0], [0], [1], [0, 0, 1, 1], [], []>} : vector<32x128xf32>, vector<128x128xf32>, vector<32x128xf32> -> vector<32x128xf32>
    %cst_9 = arith.constant 0.000000e+00 : f32
    %7 = vector.broadcast %cst_9 : f32 to vector<32x128xf32>
    %c0_i32 = arith.constant 0 : i32
    %cst_10 = arith.constant dense<0.000000e+00> : vector<32x128xf32>
    %8 = tpu.matmul %2, %7, %cst_10 {dimension_numbers = #tpu.dot_dimension_numbers<[1], [0], [0], [1], [0, 0, 1, 1], [], []>} : vector<32x32xf32>, vector<32x128xf32>, vector<32x128xf32> -> vector<32x128xf32>
    %cst_11 = arith.constant dense<0.000000e+00> : vector<32x128xf32>
    %9 = tpu.matmul %8, %4, %cst_11 {dimension_numbers = #tpu.dot_dimension_numbers<[1], [0], [0], [1], [0, 0, 1, 1], [], []>} : vector<32x128xf32>, vector<128x128xf32>, vector<32x128xf32> -> vector<32x128xf32>
    %10 = arith.addf %6, %9 : vector<32x128xf32>
    %11 = math.tanh %10 : vector<32x128xf32>
    %c1_i32 = arith.constant 1 : i32
    %cst_12 = arith.constant dense<0.000000e+00> : vector<32x128xf32>
    %12 = tpu.matmul %2, %11, %cst_12 {dimension_numbers = #tpu.dot_dimension_numbers<[1], [0], [0], [1], [0, 0, 1, 1], [], []>} : vector<32x32xf32>, vector<32x128xf32>, vector<32x128xf32> -> vector<32x128xf32>
    %cst_13 = arith.constant dense<0.000000e+00> : vector<32x128xf32>
    %13 = tpu.matmul %12, %4, %cst_13 {dimension_numbers = #tpu.dot_dimension_numbers<[1], [0], [0], [1], [0, 0, 1, 1], [], []>} : vector<32x128xf32>, vector<128x128xf32>, vector<32x128xf32> -> vector<32x128xf32>
    %14 = arith.addf %6, %13 : vector<32x128xf32>
    %15 = math.tanh %14 : vector<32x128xf32>
    %c2_i32 = arith.constant 2 : i32
    %cst_14 = arith.constant dense<0.000000e+00> : vector<32x128xf32>
    %16 = tpu.matmul %2, %15, %cst_14 {dimension_numbers = #tpu.dot_dimension_numbers<[1], [0], [0], [1], [0, 0, 1, 1], [], []>} : vector<32x32xf32>, vector<32x128xf32>, vector<32x128xf32> -> vector<32x128xf32>
    %cst_15 = arith.constant dense<0.000000e+00> : vector<32x128xf32>
    %17 = tpu.matmul %16, %4, %cst_15 {dimension_numbers = #tpu.dot_dimension_numbers<[1], [0], [0], [1], [0, 0, 1, 1], [], []>} : vector<32x128xf32>, vector<128x128xf32>, vector<32x128xf32> -> vector<32x128xf32>
    %18 = arith.addf %6, %17 : vector<32x128xf32>
    %19 = math.tanh %18 : vector<32x128xf32>
    %c3_i32 = arith.constant 3 : i32
    %cst_16 = arith.constant dense<0.000000e+00> : vector<32x128xf32>
    %20 = tpu.matmul %2, %19, %cst_16 {dimension_numbers = #tpu.dot_dimension_numbers<[1], [0], [0], [1], [0, 0, 1, 1], [], []>} : vector<32x32xf32>, vector<32x128xf32>, vector<32x128xf32> -> vector<32x128xf32>
    %cst_17 = arith.constant dense<0.000000e+00> : vector<32x128xf32>
    %21 = tpu.matmul %20, %4, %cst_17 {dimension_numbers = #tpu.dot_dimension_numbers<[1], [0], [0], [1], [0, 0, 1, 1], [], []>} : vector<32x128xf32>, vector<128x128xf32>, vector<32x128xf32> -> vector<32x128xf32>
    %22 = arith.addf %6, %21 : vector<32x128xf32>
    %23 = math.tanh %22 : vector<32x128xf32>
    %c4_i32 = arith.constant 4 : i32
    %cst_18 = arith.constant dense<0.000000e+00> : vector<32x128xf32>
    %24 = tpu.matmul %2, %23, %cst_18 {dimension_numbers = #tpu.dot_dimension_numbers<[1], [0], [0], [1], [0, 0, 1, 1], [], []>} : vector<32x32xf32>, vector<32x128xf32>, vector<32x128xf32> -> vector<32x128xf32>
    %cst_19 = arith.constant dense<0.000000e+00> : vector<32x128xf32>
    %25 = tpu.matmul %24, %4, %cst_19 {dimension_numbers = #tpu.dot_dimension_numbers<[1], [0], [0], [1], [0, 0, 1, 1], [], []>} : vector<32x128xf32>, vector<128x128xf32>, vector<32x128xf32> -> vector<32x128xf32>
    %26 = arith.addf %6, %25 : vector<32x128xf32>
    %27 = math.tanh %26 : vector<32x128xf32>
    %c5_i32 = arith.constant 5 : i32
    %cst_20 = arith.constant dense<0.000000e+00> : vector<32x128xf32>
    %28 = tpu.matmul %2, %27, %cst_20 {dimension_numbers = #tpu.dot_dimension_numbers<[1], [0], [0], [1], [0, 0, 1, 1], [], []>} : vector<32x32xf32>, vector<32x128xf32>, vector<32x128xf32> -> vector<32x128xf32>
    %cst_21 = arith.constant dense<0.000000e+00> : vector<32x128xf32>
    %29 = tpu.matmul %28, %4, %cst_21 {dimension_numbers = #tpu.dot_dimension_numbers<[1], [0], [0], [1], [0, 0, 1, 1], [], []>} : vector<32x128xf32>, vector<128x128xf32>, vector<32x128xf32> -> vector<32x128xf32>
    %30 = arith.addf %6, %29 : vector<32x128xf32>
    %31 = math.tanh %30 : vector<32x128xf32>
    %c6_i32 = arith.constant 6 : i32
    %cst_22 = arith.constant dense<0.000000e+00> : vector<32x128xf32>
    %32 = tpu.matmul %2, %31, %cst_22 {dimension_numbers = #tpu.dot_dimension_numbers<[1], [0], [0], [1], [0, 0, 1, 1], [], []>} : vector<32x32xf32>, vector<32x128xf32>, vector<32x128xf32> -> vector<32x128xf32>
    %cst_23 = arith.constant dense<0.000000e+00> : vector<32x128xf32>
    %33 = tpu.matmul %32, %4, %cst_23 {dimension_numbers = #tpu.dot_dimension_numbers<[1], [0], [0], [1], [0, 0, 1, 1], [], []>} : vector<32x128xf32>, vector<128x128xf32>, vector<32x128xf32> -> vector<32x128xf32>
    %34 = arith.addf %6, %33 : vector<32x128xf32>
    %35 = math.tanh %34 : vector<32x128xf32>
    %c7_i32 = arith.constant 7 : i32
    %cst_24 = arith.constant dense<0.000000e+00> : vector<32x128xf32>
    %36 = tpu.matmul %2, %35, %cst_24 {dimension_numbers = #tpu.dot_dimension_numbers<[1], [0], [0], [1], [0, 0, 1, 1], [], []>} : vector<32x32xf32>, vector<32x128xf32>, vector<32x128xf32> -> vector<32x128xf32>
    %cst_25 = arith.constant dense<0.000000e+00> : vector<32x128xf32>
    %37 = tpu.matmul %36, %4, %cst_25 {dimension_numbers = #tpu.dot_dimension_numbers<[1], [0], [0], [1], [0, 0, 1, 1], [], []>} : vector<32x128xf32>, vector<128x128xf32>, vector<32x128xf32> -> vector<32x128xf32>
    %38 = arith.addf %6, %37 : vector<32x128xf32>
    %39 = math.tanh %38 : vector<32x128xf32>
    %40 = vector.shape_cast %39 : vector<32x128xf32> to vector<2x16x128xf32>
    %cst_26 = arith.constant dense<0.000000e+00> : vector<2x128xf32>
    %41 = vector.multi_reduction <add>, %40, %cst_26 [1] : vector<2x16x128xf32> to vector<2x128xf32>
    %c0_27 = arith.constant 0 : index
    %c0_28 = arith.constant 0 : index
    %c0_29 = arith.constant 0 : index
    %42 = vector.load %arg5[%c0_27, %c0_28, %c0_29] : memref<1x2x128xf32, #tpu.memory_space<vmem>>, vector<1x2x128xf32>
    %43 = vector.shape_cast %42 : vector<1x2x128xf32> to vector<2x128xf32>
    %44 = vector.shape_cast %41 : vector<2x128xf32> to vector<1x2x128xf32>
    tpu.vector_store %arg5[%c0_27, %c0_28, %c0_29], %44 {strides = array<i32>} : memref<1x2x128xf32, #tpu.memory_space<vmem>>, vector<1x2x128xf32>,
    return
  }
  func.func @transform_0(%arg0: i32) -> (i32, i32, i32) {
    %c0_i32 = arith.constant 0 : i32
    %c0_i32_0 = arith.constant 0 : i32
    %c0_i32_1 = arith.constant 0 : i32
    return %arg0, %c0_i32, %c0_i32_0 : i32, i32, i32
  }
  func.func @transform_1(%arg0: i32) -> (i32, i32, i32) {
    %c0_i32 = arith.constant 0 : i32
    %c0_i32_0 = arith.constant 0 : i32
    %c0_i32_1 = arith.constant 0 : i32
    return %arg0, %c0_i32, %c0_i32_0 : i32, i32, i32
  }
  func.func @transform_2(%arg0: i32) -> (i32, i32) {
    %c0_i32 = arith.constant 0 : i32
    %c0_i32_0 = arith.constant 0 : i32
    %c0_i32_1 = arith.constant 0 : i32
    return %c0_i32, %c0_i32_0 : i32, i32
  }
  func.func @transform_3(%arg0: i32) -> (i32, i32) {
    %c0_i32 = arith.constant 0 : i32
    %c0_i32_0 = arith.constant 0 : i32
    %c0_i32_1 = arith.constant 0 : i32
    return %c0_i32, %c0_i32_0 : i32, i32
  }
  func.func @transform_4(%arg0: i32) -> (i32, i32, i32) {
    %c0_i32 = arith.constant 0 : i32
    %c0_i32_0 = arith.constant 0 : i32
    %c0_i32_1 = arith.constant 0 : i32
    return %arg0, %c0_i32, %c0_i32_0 : i32, i32, i32
  }
}

</mosaic_0001>

<bundles_post_ra>
// kernel: tpu_custom_call.1
= control target key start
LH: loop header
LB: loop body
LE: loop exit
PB: predicated region body
PF: predicated region fallthrough
CT: control target
= control target key end

     0   :  { %9 = vsyncpa [#allocation3], 0  ;;  %s3023_s0 = inlined_call_operand.hbm [shape: f32[2,16,128], index: 0, kind: input, shape index: {}]   ;;  %s3024_s1 = inlined_call_operand.hbm [shape: f32[1,32,32], index: 1, kind: input, shape index: {}]   ;;  %s3025_s2 = inlined_call_operand.hbm [shape: f32[128,128], index: 2, kind: input, shape index: {}]   ;;  %s3026_s3 = inlined_call_operand.hbm [shape: f32[128,128], index: 3, kind: input, shape index: {}]   ;;  %s3027_s4 = inlined_call_operand.hbm [shape: f32[1,2,128], index: 4, kind: output, shape index: {}]  }
   0x1   :  { %10 = vsyncpa [#allocation6], 0 }
   0x2   :  { %11 = vsyncpa [#allocation9], 0 }
   0x3   :  { %12 = vsyncpa [#allocation4], 0  ;;  %s2583_s15 = smov [#allocation5]   ;;  %s2584_s17 = smov [#allocation2]  }
   0x4   :  { %s30_s16 = sshll.u32 %s2583_s15, 4  ;;  %s18_s18 = sshll.u32 %s2584_s17, 4  ;;  %s31_s16 = int_to_ptr.vmem [resolvable:$true] %s30_s16  ;;  %s19_s18 = int_to_ptr.vmem [resolvable:$true] %s18_s18 }
   0x5   :  { %s2483_s19 = scalar_lea.vmem %s31_s16, 512  ;;  %p2488_p1 = scmp.lt.s32.totalorder %s31_s16, %s31_s16 }
   0x6   :  { %p2484_p0 = scmp.ne.s32.totalorder %s31_s16, %s2483_s19  ;;  %p2489_p2 = scmp.lt.s32.totalorder %s2483_s19, %s2483_s19 }
   0x8   :  { %p2490_p3 = por %p2489_p2, %p2488_p1 }
   0xa   :  { %p2491_p4 = pnand %p2490_p3, %p2484_p0 }
   0xc   :  { %2494 = shalt.err (!%p2491_p4)
}
   0xd   :  { %s2585_s20 = smov 128   ;;  %s2586_s21 = smov 8  }
   0xe   :  { %36 = dma.hbm_to_vmem [thread:$0]  %s3024_s1, 512, %s31_s16, [#allocation6], %s2585_s20, %s2585_s20, %s2586_s21  }
   0xf   :  { %s2503_s24 = scalar_lea.vmem %s19_s18, 512  ;;  %p2508_p6 = scmp.lt.s32.totalorder %s19_s18, %s19_s18 }
  0x10   :  { %p2504_p5 = scmp.ne.s32.totalorder %s19_s18, %s2503_s24  ;;  %p2509_p7 = scmp.lt.s32.totalorder %s2503_s24, %s2503_s24 }
  0x12   :  { %p2510_p8 = por %p2509_p7, %p2508_p6 }
  0x14   :  { %p2511_p9 = pnand %p2510_p8, %p2504_p5 }
  0x16   :  { %2514 = shalt.err (!%p2511_p9)
}
  0x17   :  { %24 = dma.hbm_to_vmem [thread:$0]  %s3023_s0, 512, %s19_s18, [#allocation3], %s2585_s20, %s2585_s20, %s2586_s21  }
  0x18   :  { %s2587_s27 = smov [#allocation7]   ;;  %s2588_s29 = smov [#allocation8]  }
  0x19   :  { %s42_s28 = sshll.u32 %s2587_s27, 4  ;;  %s54_s30 = sshll.u32 %s2588_s29, 4  ;;  %s43_s28 = int_to_ptr.vmem [resolvable:$true] %s42_s28  ;;  %s55_s30 = int_to_ptr.vmem [resolvable:$true] %s54_s30 }
  0x1a   :  { %s2523_s1 = scalar_lea.vmem %s43_s28, 2048  ;;  %p2528_p11 = scmp.lt.s32.totalorder %s43_s28, %s43_s28 }
  0x1b   :  { %p2524_p10 = scmp.ne.s32.totalorder %s43_s28, %s2523_s1  ;;  %p2529_p12 = scmp.lt.s32.totalorder %s2523_s1, %s2523_s1 }
  0x1d   :  { %p2530_p13 = por %p2529_p12, %p2528_p11 }
  0x1f   :  { %p2531_p0 = pnand %p2530_p13, %p2524_p10 }
  0x21   :  { %2534 = shalt.err (!%p2531_p0)
}
  0x22   :  { %48 = dma.hbm_to_vmem [thread:$0]  %s3025_s2, 2048, %s43_s28, [#allocation6], %s2585_s20, %s2585_s20, %s2586_s21  }
  0x23   :  { %s2543_s0 = scalar_lea.vmem %s55_s30, 2048  ;;  %p2548_p2 = scmp.lt.s32.totalorder %s55_s30, %s55_s30 }
  0x24   :  { %p2544_p1 = scmp.ne.s32.totalorder %s55_s30, %s2543_s0  ;;  %p2549_p3 = scmp.lt.s32.totalorder %s2543_s0, %s2543_s0 }
  0x26   :  { %p2550_p4 = por %p2549_p3, %p2548_p2 }
  0x28   :  { %p2551_p5 = pnand %p2550_p4, %p2544_p1 }
  0x2a   :  { %2554 = shalt.err (!%p2551_p5)
}
  0x2b   :  { %60 = dma.hbm_to_vmem [thread:$0]  %s3026_s3, 2048, %s55_s30, [#allocation9], %s2585_s20, %s2585_s20, %s2586_s21  }
  0x2c   :  { %2575 = dma.done.wait [#allocation3], 512  }
  0x2d   :  { %2576 = vsyncadd [#allocation3], 4294966784 }
  0x2e   :  { %2577 = dma.done.wait [#allocation6], 2560  }
  0x2f   :  { %2578 = vsyncadd [#allocation6], 4294964736 }
  0x30   :  { %2579 = dma.done.wait [#allocation9], 2048  }
  0x31   :  { %2580 = vsyncadd [#allocation9], 4294965248  ;;  %v96_v0 = vld [vmem:[#allocation7 + $0x78] sm:$0xff]  ;;  %v95_v1 = vld [vmem:[#allocation7 + $0x70] sm:$0xff]  ;;  %v2589_v29 = vmov 0.0   ;;  %vm198_vm0 = vcmask 261120  }
  0x32   :  { %1945 = vmatprep.subr.mxu0 %v96_v0  ;;  %v94_v2 = vld [vmem:[#allocation7 + $0x68] sm:$0xff]  ;;  %v93_v3 = vld [vmem:[#allocation7 + $0x60] sm:$0xff]  ;;  %v92_v5 = vld [vmem:[#allocation7 + $0x58] sm:$0xff]  ;;  %s2590_s2 = smov [#allocation10]   ;;  %vm1651_vm1 = vcmask 1041409  }
  0x33   :  { %1946 = vmatpush3.msra.mxu0 %v96_v0  ;;  %v73_v4 = vld [vmem:[#allocation2] sm:$0xff]  ;;  %v91_v6 = vld [vmem:[#allocation7 + $0x50] sm:$0xff]  ;;  %v2640_v7 = vld [vmem:[#allocation8 + $0x78] sm:$0xff]  ;;  %s1661_s3 = sshll.u32 %s2590_s2, 4  ;;  %s1662_s3 = int_to_ptr.vmem [resolvable:$true] %s1661_s3 }
  0x34   :  { %1947 = vmatprep.subr.mxu0 %v95_v1  ;;  %1977 = vmatprep.mubr.f32.mxu0 %v73_v4  ;;  %v2642_v8 = vld [vmem:[#allocation8 + $0x70] sm:$0xff]  ;;  %v90_v9 = vld [vmem:[#allocation7 + $0x48] sm:$0xff]  ;;  %v89_v11 = vld [vmem:[#allocation7 + $0x40] sm:$0xff]  ;;  %s2555_s9 = scalar_lea.vmem %s1662_s3, 32  ;;  %p2560_p7 = scmp.lt.s32.totalorder %s1662_s3, %s1662_s3 }
  0x35   :  { %1948 = vmatpush3.msra.mxu0 %v95_v1  ;;  %1991 = vmatprep.subr.mxu1 %v2640_v7  ;;  %v2646_v10 = vld [vmem:[#allocation8 + $0x68] sm:$0xff]  ;;  %v2650_v12 = vld [vmem:[#allocation8 + $0x60] sm:$0xff]  ;;  %v88_v13 = vld [vmem:[#allocation7 + $0x38] sm:$0xff]  ;;  %p2556_p6 = scmp.ne.s32.totalorder %s1662_s3, %s2555_s9  ;;  %p2561_p8 = scmp.lt.s32.totalorder %s2555_s9, %s2555_s9 }
  0x36   :  { %1949 = vmatprep.subr.mxu0 %v94_v2  ;;  %1992 = vmatpush3.msra.mxu1 %v2640_v7  ;;  %v2654_v14 = vld [vmem:[#allocation8 + $0x58] sm:$0xff]  ;;  %v87_v15 = vld [vmem:[#allocation7 + $0x30] sm:$0xff]  ;;  %v86_v17 = vld [vmem:[#allocation7 + $0x28] sm:$0xff] }
  0x37   :  { %1950 = vmatpush3.msra.mxu0 %v94_v2  ;;  %1993 = vmatprep.subr.mxu1 %v2642_v8  ;;  %v2658_v16 = vld [vmem:[#allocation8 + $0x50] sm:$0xff]  ;;  %v2662_v18 = vld [vmem:[#allocation8 + $0x48] sm:$0xff]  ;;  %v85_v19 = vld [vmem:[#allocation7 + $0x20] sm:$0xff]  ;;  %p2562_p9 = por %p2561_p8, %p2560_p7 }
  0x38   :  { %1951 = vmatprep.subr.mxu0 %v93_v3  ;;  %1994 = vmatpush3.msra.mxu1 %v2642_v8  ;;  %v2666_v20 = vld [vmem:[#allocation8 + $0x40] sm:$0xff]  ;;  %v84_v21 = vld [vmem:[#allocation7 + $0x18] sm:$0xff]  ;;  %v83_v23 = vld [vmem:[#allocation7 + $0x10] sm:$0xff] }
  0x39   :  { %1952 = vmatpush3.msra.mxu0 %v93_v3  ;;  %1995 = vmatprep.subr.mxu1 %v2646_v10  ;;  %v2670_v22 = vld [vmem:[#allocation8 + $0x38] sm:$0xff]  ;;  %v2674_v24 = vld [vmem:[#allocation8 + $0x30] sm:$0xff]  ;;  %v82_v25 = vld [vmem:[#allocation7 + $0x8] sm:$0xff]  ;;  %p2563_p10 = pnand %p2562_p9, %p2556_p6 }
  0x3a   :  { %1953 = vmatprep.subr.mxu0 %v92_v5  ;;  %1996 = vmatpush3.msra.mxu1 %v2646_v10  ;;  %v81_v26 = vld [vmem:[#allocation7] sm:$0xff]  ;;  %v74_v27 = vld [vmem:[#allocation2 + $0x8] sm:$0xff]  ;;  %v75_v28 = vld [vmem:[#allocation2 + $0x10] sm:$0xff] }
  0x3b   :  { %1954 = vmatpush3.msra.mxu0 %v92_v5  ;;  %1997 = vmatprep.subr.mxu1 %v2650_v12  ;;  %v76_v30 = vld [vmem:[#allocation2 + $0x18] sm:$0xff]  ;;  %v2680_v31 = vld [vmem:[#allocation5] sm:$0xff]  ;;  %v2684_v32 = vld [vmem:[#allocation5 + $0x8] sm:$0xff] }
  0x3c   :  { %1955 = vmatprep.subr.mxu0 %v91_v6  ;;  %1998 = vmatpush3.msra.mxu1 %v2650_v12  ;;  %v2686_v33 = vld [vmem:[#allocation5 + $0x10] sm:$0xff]  ;;  %v2692_v34 = vld [vmem:[#allocation5 + $0x18] sm:$0xff]  ;;  %v2698_v35 = vld [vmem:[#allocation8 + $0x28] sm:$0xff] }
  0x3d   :  { %1956 = vmatpush3.msra.mxu0 %v91_v6  ;;  %1999 = vmatprep.subr.mxu1 %v2654_v14  ;;  %v2702_v36 = vld [vmem:[#allocation8 + $0x20] sm:$0xff]  ;;  %v2706_v37 = vld [vmem:[#allocation8 + $0x18] sm:$0xff]  ;;  %v2710_v38 = vld [vmem:[#allocation8 + $0x10] sm:$0xff] }
  0x3e   :  { %1957 = vmatprep.subr.mxu0 %v90_v9  ;;  %2000 = vmatpush3.msra.mxu1 %v2654_v14  ;;  %v2714_v39 = vld [vmem:[#allocation8 + $0x8] sm:$0xff]  ;;  %v2718_v40 = vld [vmem:[#allocation8] sm:$0xff] }
  0x3f   :  { %1958 = vmatpush3.msra.mxu0 %v90_v9  ;;  %2001 = vmatprep.subr.mxu1 %v2658_v16 }
  0x40   :  { %1959 = vmatprep.subr.mxu0 %v89_v11  ;;  %2002 = vmatpush3.msra.mxu1 %v2658_v16 }
  0x41   :  { %1960 = vmatpush3.msra.mxu0 %v89_v11  ;;  %2003 = vmatprep.subr.mxu1 %v2662_v18 }
  0x42   :  { %1961 = vmatprep.subr.mxu0 %v88_v13  ;;  %2004 = vmatpush3.msra.mxu1 %v2662_v18 }
  0x43   :  { %1962 = vmatpush3.msra.mxu0 %v88_v13  ;;  %2005 = vmatprep.subr.mxu1 %v2666_v20 }
  0x44   :  { %1963 = vmatprep.subr.mxu0 %v87_v15  ;;  %2006 = vmatpush3.msra.mxu1 %v2666_v20 }
  0x45   :  { %1964 = vmatpush3.msra.mxu0 %v87_v15  ;;  %2007 = vmatprep.subr.mxu1 %v2670_v22 }
  0x46   :  { %1965 = vmatprep.subr.mxu0 %v86_v17  ;;  %2008 = vmatpush3.msra.mxu1 %v2670_v22 }
  0x47   :  { %1966 = vmatpush3.msra.mxu0 %v86_v17  ;;  %2009 = vmatprep.subr.mxu1 %v2674_v24 }
  0x48   :  { %1967 = vmatprep.subr.mxu0 %v85_v19  ;;  %2010 = vmatpush3.msra.mxu1 %v2674_v24 }
  0x49   :  { %1968 = vmatpush3.msra.mxu0 %v85_v19  ;;  %2011 = vmatprep.subr.mxu1 %v2698_v35 }
  0x4a   :  { %1969 = vmatprep.subr.mxu0 %v84_v21  ;;  %2012 = vmatpush3.msra.mxu1 %v2698_v35 }
  0x4b   :  { %1970 = vmatpush3.msra.mxu0 %v84_v21  ;;  %2013 = vmatprep.subr.mxu1 %v2702_v36 }
  0x4c   :  { %1971 = vmatprep.subr.mxu0 %v83_v23  ;;  %2014 = vmatpush3.msra.mxu1 %v2702_v36 }
  0x4d   :  { %1972 = vmatpush3.msra.mxu0 %v83_v23  ;;  %2015 = vmatprep.subr.mxu1 %v2706_v37 }
  0x4e   :  { %1973 = vmatprep.subr.mxu0 %v82_v25  ;;  %2016 = vmatpush3.msra.mxu1 %v2706_v37 }
  0x4f   :  { %1974 = vmatpush3.msra.mxu0 %v82_v25  ;;  %2017 = vmatprep.subr.mxu1 %v2710_v38 }
  0x50   :  { %1975 = vmatprep.subr.mxu0 %v81_v26  ;;  %2018 = vmatpush3.msra.mxu1 %v2710_v38 }
  0x51   :  { %1976 = vmatpush3.msra.mxu0 %v81_v26  ;;  %2019 = vmatprep.subr.mxu1 %v2714_v39 }
  0x52   :  { %1978 = vmatmul.mubr.f32.vlgmr.msra.gmra.mxu0 %v74_v27  ;;  %1983 = vmatprep.subr.mxu0 %v2589_v29 }
  0x53   :  { %1984 = vmatpush3.msra.mxu0 %v2589_v29  ;;  %1980 = vmatprep.mubr.f32.mxu0 %v75_v28 }
  0x54   :  { %2020 = vmatpush3.msra.mxu1 %v2714_v39 }
  0x55   :  { %2021 = vmatprep.subr.mxu1 %v2718_v40 }
  0x56   :  { %1981 = vmatmul.mubr.f32.gmra.mxu0 %v76_v30  ;;  %2022 = vmatpush3.msra.mxu1 %v2718_v40 }
  0x57   :  { %1985 = vmatprep.mubr.msk.f32.mxu0 %vm198_vm0, %v2680_v31  ;;  %2043 = vmatprep.subr.mxu1 %v2640_v7 }
  0x5a   :  { %1986 = vmatmul.mubr.msk.f32.vlgmr.msra.gmra.mxu0 %vm198_vm0, %v2684_v32 }
  0x5b   :  { %1988 = vmatprep.mubr.msk.f32.mxu0 %vm198_vm0, %v2686_v33 }
  0x5e   :  { %1989 = vmatmul.mubr.msk.f32.gmra.mxu0 %vm198_vm0, %v2692_v34 }
  0x5f   :  { %2037 = vmatprep.mubr.msk.f32.mxu0 %vm198_vm0, %v2680_v31 }
 0x112   :  { %v2723_v41 = vpop.f32.mrf.mxu0 }
 0x114   :  { %v2725_v42 = vpop.f32.mrf.mxu0 }
 0x116   :  { %v2727_v43 = vpop.f32.mrf.mxu0 }
 0x118   :  { %v2729_v44 = vpop.f32.mrf.mxu0 }
 0x11a   :  { %v1987_v45 = vpop.f32.mrf.mxu0 }
 0x11c   :  { %v277_v46 = vpop.f32.mrf.mxu0 }
 0x11d   :  { %2023 = vmatprep.mubr.f32.mxu1 %v277_v46 }
 0x11e   :  { %v1990_v47 = vpop.f32.mrf.mxu0  ;;  %2024 = vmatmul.mubr.f32.vlgmr.msra.gmra.mxu1 %v1987_v45 }
 0x11f   :  { %2044 = vmatpush3.msra.mxu1 %v2640_v7 }
 0x120   :  { %v287_v48 = vpop.f32.mrf.mxu0  ;;  %2045 = vmatprep.subr.mxu1 %v2642_v8 }
 0x121   :  { %2026 = vmatprep.mubr.f32.mxu1 %v287_v48  ;;  %2046 = vmatpush3.msra.mxu1 %v2642_v8 }
 0x122   :  { %2027 = vmatmul.mubr.f32.gmra.mxu1 %v1990_v47  ;;  %2047 = vmatprep.subr.mxu1 %v2646_v10 }
 0x123   :  { %2048 = vmatpush3.msra.mxu1 %v2646_v10 }
 0x124   :  { %2049 = vmatprep.subr.mxu1 %v2650_v12 }
 0x125   :  { %2050 = vmatpush3.msra.mxu1 %v2650_v12 }
 0x126   :  { %2051 = vmatprep.subr.mxu1 %v2654_v14 }
 0x127   :  { %2052 = vmatpush3.msra.mxu1 %v2654_v14 }
 0x128   :  { %2053 = vmatprep.subr.mxu1 %v2658_v16 }
 0x129   :  { %2054 = vmatpush3.msra.mxu1 %v2658_v16 }
 0x12a   :  { %2055 = vmatprep.subr.mxu1 %v2662_v18 }
 0x12b   :  { %2056 = vmatpush3.msra.mxu1 %v2662_v18 }
 0x12c   :  { %2057 = vmatprep.subr.mxu1 %v2666_v20 }
 0x12d   :  { %2058 = vmatpush3.msra.mxu1 %v2666_v20 }
 0x12e   :  { %2059 = vmatprep.subr.mxu1 %v2670_v22 }
 0x12f   :  { %2060 = vmatpush3.msra.mxu1 %v2670_v22 }
 0x130   :  { %2061 = vmatprep.subr.mxu1 %v2674_v24 }
 0x131   :  { %2062 = vmatpush3.msra.mxu1 %v2674_v24 }
 0x132   :  { %2063 = vmatprep.subr.mxu1 %v2698_v35 }
 0x133   :  { %2064 = vmatpush3.msra.mxu1 %v2698_v35 }
 0x134   :  { %2065 = vmatprep.subr.mxu1 %v2702_v36 }
 0x135   :  { %2066 = vmatpush3.msra.mxu1 %v2702_v36 }
 0x136   :  { %2067 = vmatprep.subr.mxu1 %v2706_v37 }
 0x137   :  { %2068 = vmatpush3.msra.mxu1 %v2706_v37 }
 0x138   :  { %2069 = vmatprep.subr.mxu1 %v2710_v38 }
 0x139   :  { %2070 = vmatpush3.msra.mxu1 %v2710_v38 }
 0x13a   :  { %2071 = vmatprep.subr.mxu1 %v2714_v39 }
 0x13b   :  { %2072 = vmatpush3.msra.mxu1 %v2714_v39 }
 0x13c   :  { %2073 = vmatprep.subr.mxu1 %v2718_v40 }
 0x13d   :  { %2074 = vmatpush3.msra.mxu1 %v2718_v40 }
 0x13e   :  { %2147 = vmatprep.subr.mxu1 %v2640_v7 }
 0x1de   :  { %v2025_v49 = vpop.f32.mrf.mxu1 }
 0x1df   :  { %v382_v54 = vadd.f32 %v2025_v49, %v2723_v41 }
 0x1e0   :  { %v362_v50 = vpop.f32.mrf.mxu1 }
 0x1e1   :  { %v381_v56 = vadd.f32 %v362_v50, %v2725_v42 }
 0x1e2   :  { %v2028_v51 = vpop.f32.mrf.mxu1 }
 0x1e3   :  { %v384_v52 = vadd.f32 %v2028_v51, %v2727_v43 }
 0x1e4   :  { %v372_v53 = vpop.f32.mrf.mxu1 }
 0x1e5   :  { %2401 = vtanh.f32 %v384_v52  ;;  %v383_v55 = vadd.f32 %v372_v53, %v2729_v44 }
 0x1e7   :  { %2403 = vtanh.f32 %v383_v55 }
 0x1e8   :  { %2405 = vtanh.f32 %v382_v54 }
 0x1e9   :  { %2407 = vtanh.f32 %v381_v56 }
 0x1f2   :  { %v2402_v57 = vpop.eup %2401 }
 0x1f3   :  { %2029 = vmatprep.subr.mxu0 %v2402_v57 }
 0x1f4   :  { %v2404_v58 = vpop.eup %2403  ;;  %2030 = vmatpush3.msra.mxu0 %v2402_v57 }
 0x1f5   :  { %2031 = vmatprep.subr.mxu0 %v2404_v58  ;;  %v2406_v59 = vpop.eup %2405 }
 0x1f6   :  { %2032 = vmatpush3.msra.mxu0 %v2404_v58  ;;  %v2408_v60 = vpop.eup %2407 }
 0x1f7   :  { %2033 = vmatprep.subr.mxu0 %v2406_v59 }
 0x1f8   :  { %2034 = vmatpush3.msra.mxu0 %v2406_v59 }
 0x1f9   :  { %2035 = vmatprep.subr.mxu0 %v2408_v60 }
 0x1fa   :  { %2036 = vmatpush3.msra.mxu0 %v2408_v60 }
 0x1fb   :  { %2038 = vmatmul.mubr.msk.f32.vlgmr.msra.gmra.mxu0 %vm198_vm0, %v2684_v32 }
 0x1fc   :  { %2040 = vmatprep.mubr.msk.f32.mxu0 %vm198_vm0, %v2686_v33 }
 0x1ff   :  { %2041 = vmatmul.mubr.msk.f32.gmra.mxu0 %vm198_vm0, %v2692_v34 }
 0x200   :  { %2089 = vmatprep.mubr.msk.f32.mxu0 %vm198_vm0, %v2680_v31 }
 0x2bb   :  { %v2039_v61 = vpop.f32.mrf.mxu0 }
 0x2bd   :  { %v455_v62 = vpop.f32.mrf.mxu0 }
 0x2be   :  { %2075 = vmatprep.mubr.f32.mxu1 %v455_v62 }
 0x2bf   :  { %v2042_v63 = vpop.f32.mrf.mxu0  ;;  %2076 = vmatmul.mubr.f32.vlgmr.msra.gmra.mxu1 %v2039_v61 }
 0x2c0   :  { %2148 = vmatpush3.msra.mxu1 %v2640_v7 }
 0x2c1   :  { %v465_v0 = vpop.f32.mrf.mxu0  ;;  %2149 = vmatprep.subr.mxu1 %v2642_v8 }
 0x2c2   :  { %2078 = vmatprep.mubr.f32.mxu1 %v465_v0  ;;  %2150 = vmatpush3.msra.mxu1 %v2642_v8 }
 0x2c3   :  { %2079 = vmatmul.mubr.f32.gmra.mxu1 %v2042_v63  ;;  %2151 = vmatprep.subr.mxu1 %v2646_v10 }
 0x2c4   :  { %2152 = vmatpush3.msra.mxu1 %v2646_v10 }
 0x2c5   :  { %2153 = vmatprep.subr.mxu1 %v2650_v12 }
 0x2c6   :  { %2154 = vmatpush3.msra.mxu1 %v2650_v12 }
 0x2c7   :  { %2155 = vmatprep.subr.mxu1 %v2654_v14 }
 0x2c8   :  { %2156 = vmatpush3.msra.mxu1 %v2654_v14 }
 0x2c9   :  { %2157 = vmatprep.subr.mxu1 %v2658_v16 }
 0x2ca   :  { %2158 = vmatpush3.msra.mxu1 %v2658_v16 }
 0x2cb   :  { %2159 = vmatprep.subr.mxu1 %v2662_v18 }
 0x2cc   :  { %2160 = vmatpush3.msra.mxu1 %v2662_v18 }
 0x2cd   :  { %2161 = vmatprep.subr.mxu1 %v2666_v20 }
 0x2ce   :  { %2162 = vmatpush3.msra.mxu1 %v2666_v20 }
 0x2cf   :  { %2163 = vmatprep.subr.mxu1 %v2670_v22 }
 0x2d0   :  { %2164 = vmatpush3.msra.mxu1 %v2670_v22 }
 0x2d1   :  { %2165 = vmatprep.subr.mxu1 %v2674_v24 }
 0x2d2   :  { %2166 = vmatpush3.msra.mxu1 %v2674_v24 }
 0x2d3   :  { %2167 = vmatprep.subr.mxu1 %v2698_v35 }
 0x2d4   :  { %2168 = vmatpush3.msra.mxu1 %v2698_v35 }
 0x2d5   :  { %2169 = vmatprep.subr.mxu1 %v2702_v36 }
 0x2d6   :  { %2170 = vmatpush3.msra.mxu1 %v2702_v36 }
 0x2d7   :  { %2171 = vmatprep.subr.mxu1 %v2706_v37 }
 0x2d8   :  { %2172 = vmatpush3.msra.mxu1 %v2706_v37 }
 0x2d9   :  { %2173 = vmatprep.subr.mxu1 %v2710_v38 }
 0x2da   :  { %2174 = vmatpush3.msra.mxu1 %v2710_v38 }
 0x2db   :  { %2175 = vmatprep.subr.mxu1 %v2714_v39 }
 0x2dc   :  { %2176 = vmatpush3.msra.mxu1 %v2714_v39 }
 0x2dd   :  { %2177 = vmatprep.subr.mxu1 %v2718_v40 }
 0x2de   :  { %2178 = vmatpush3.msra.mxu1 %v2718_v40 }
 0x37f   :  { %v2077_v1 = vpop.f32.mrf.mxu1 }
 0x380   :  { %v560_v6 = vadd.f32 %v2077_v1, %v2723_v41 }
 0x381   :  { %v540_v2 = vpop.f32.mrf.mxu1 }
 0x382   :  { %v559_v11 = vadd.f32 %v540_v2, %v2725_v42 }
 0x383   :  { %v2080_v3 = vpop.f32.mrf.mxu1 }
 0x384   :  { %v562_v4 = vadd.f32 %v2080_v3, %v2727_v43 }
 0x385   :  { %v550_v5 = vpop.f32.mrf.mxu1 }
 0x386   :  { %2409 = vtanh.f32 %v562_v4  ;;  %v561_v9 = vadd.f32 %v550_v5, %v2729_v44 }
 0x388   :  { %2411 = vtanh.f32 %v561_v9 }
 0x389   :  { %2413 = vtanh.f32 %v560_v6 }
 0x38a   :  { %2415 = vtanh.f32 %v559_v11 }
 0x393   :  { %v2410_v13 = vpop.eup %2409 }
 0x394   :  { %2081 = vmatprep.subr.mxu0 %v2410_v13 }
 0x395   :  { %v2412_v15 = vpop.eup %2411  ;;  %2082 = vmatpush3.msra.mxu0 %v2410_v13 }
 0x396   :  { %2083 = vmatprep.subr.mxu0 %v2412_v15  ;;  %v2414_v17 = vpop.eup %2413 }
 0x397   :  { %2084 = vmatpush3.msra.mxu0 %v2412_v15  ;;  %v2416_v19 = vpop.eup %2415 }
 0x398   :  { %2085 = vmatprep.subr.mxu0 %v2414_v17 }
 0x399   :  { %2086 = vmatpush3.msra.mxu0 %v2414_v17 }
 0x39a   :  { %2087 = vmatprep.subr.mxu0 %v2416_v19 }
 0x39b   :  { %2088 = vmatpush3.msra.mxu0 %v2416_v19 }
 0x39c   :  { %2090 = vmatmul.mubr.msk.f32.vlgmr.msra.gmra.mxu0 %vm198_vm0, %v2684_v32  ;;  %2095 = vmatprep.subr.mxu0 %v2640_v7 }
 0x39d   :  { %2092 = vmatprep.mubr.msk.f32.mxu0 %vm198_vm0, %v2686_v33  ;;  %2096 = vmatpush3.msra.mxu0 %v2640_v7 }
 0x39e   :  { %2097 = vmatprep.subr.mxu0 %v2642_v8 }
 0x39f   :  { %2098 = vmatpush3.msra.mxu0 %v2642_v8 }
 0x3a0   :  { %2093 = vmatmul.mubr.msk.f32.gmra.mxu0 %vm198_vm0, %v2692_v34  ;;  %2099 = vmatprep.subr.mxu0 %v2646_v10 }
 0x3a1   :  { %2100 = vmatpush3.msra.mxu0 %v2646_v10 }
 0x3a2   :  { %2101 = vmatprep.subr.mxu0 %v2650_v12 }
 0x3a3   :  { %2102 = vmatpush3.msra.mxu0 %v2650_v12 }
 0x3a4   :  { %2103 = vmatprep.subr.mxu0 %v2654_v14 }
 0x3a5   :  { %2104 = vmatpush3.msra.mxu0 %v2654_v14 }
 0x3a6   :  { %2105 = vmatprep.subr.mxu0 %v2658_v16 }
 0x3a7   :  { %2106 = vmatpush3.msra.mxu0 %v2658_v16 }
 0x3a8   :  { %2107 = vmatprep.subr.mxu0 %v2662_v18 }
 0x3a9   :  { %2108 = vmatpush3.msra.mxu0 %v2662_v18 }
 0x3aa   :  { %2109 = vmatprep.subr.mxu0 %v2666_v20 }
 0x3ab   :  { %2110 = vmatpush3.msra.mxu0 %v2666_v20 }
 0x3ac   :  { %2111 = vmatprep.subr.mxu0 %v2670_v22 }
 0x3ad   :  { %2112 = vmatpush3.msra.mxu0 %v2670_v22 }
 0x3ae   :  { %2113 = vmatprep.subr.mxu0 %v2674_v24 }
 0x3af   :  { %2114 = vmatpush3.msra.mxu0 %v2674_v24 }
 0x3b0   :  { %2115 = vmatprep.subr.mxu0 %v2698_v35 }
 0x3b1   :  { %2116 = vmatpush3.msra.mxu0 %v2698_v35 }
 0x3b2   :  { %2117 = vmatprep.subr.mxu0 %v2702_v36 }
 0x3b3   :  { %2118 = vmatpush3.msra.mxu0 %v2702_v36 }
 0x3b4   :  { %2119 = vmatprep.subr.mxu0 %v2706_v37 }
 0x3b5   :  { %2120 = vmatpush3.msra.mxu0 %v2706_v37 }
 0x3b6   :  { %2121 = vmatprep.subr.mxu0 %v2710_v38 }
 0x3b7   :  { %2122 = vmatpush3.msra.mxu0 %v2710_v38 }
 0x3b8   :  { %2123 = vmatprep.subr.mxu0 %v2714_v39 }
 0x3b9   :  { %2124 = vmatpush3.msra.mxu0 %v2714_v39 }
 0x3ba   :  { %2125 = vmatprep.subr.mxu0 %v2718_v40 }
 0x3bb   :  { %2126 = vmatpush3.msra.mxu0 %v2718_v40 }
 0x45c   :  { %v2091_v21 = vpop.f32.mrf.mxu0 }
 0x45e   :  { %v633_v23 = vpop.f32.mrf.mxu0 }
 0x45f   :  { %2127 = vmatprep.mubr.f32.mxu0 %v633_v23 }
 0x460   :  { %v2094_v25 = vpop.f32.mrf.mxu0  ;;  %2128 = vmatmul.mubr.f32.vlgmr.msra.gmra.mxu0 %v2091_v21 }
 0x462   :  { %v643_v26 = vpop.f32.mrf.mxu0 }
 0x463   :  { %2130 = vmatprep.mubr.f32.mxu0 %v643_v26 }
 0x464   :  { %2131 = vmatmul.mubr.f32.gmra.mxu0 %v2094_v25 }
 0x465   :  { %2141 = vmatprep.mubr.msk.f32.mxu0 %vm198_vm0, %v2680_v31 }
 0x520   :  { %v2129_v27 = vpop.f32.mrf.mxu0 }
 0x521   :  { %v738_v46 = vadd.f32 %v2129_v27, %v2723_v41 }
 0x522   :  { %v718_v28 = vpop.f32.mrf.mxu0 }
 0x523   :  { %v737_v48 = vadd.f32 %v718_v28, %v2725_v42 }
 0x524   :  { %v2132_v29 = vpop.f32.mrf.mxu0 }
 0x525   :  { %v740_v30 = vadd.f32 %v2132_v29, %v2727_v43 }
 0x526   :  { %v728_v45 = vpop.f32.mrf.mxu0 }
 0x527   :  { %2417 = vtanh.f32 %v740_v30  ;;  %v739_v47 = vadd.f32 %v728_v45, %v2729_v44 }
 0x529   :  { %2419 = vtanh.f32 %v739_v47 }
 0x52a   :  { %2421 = vtanh.f32 %v738_v46 }
 0x52b   :  { %2423 = vtanh.f32 %v737_v48 }
 0x534   :  { %v2418_v49 = vpop.eup %2417 }
 0x535   :  { %2133 = vmatprep.subr.mxu0 %v2418_v49 }
 0x536   :  { %v2420_v50 = vpop.eup %2419  ;;  %2134 = vmatpush3.msra.mxu0 %v2418_v49 }
 0x537   :  { %2135 = vmatprep.subr.mxu0 %v2420_v50  ;;  %v2422_v51 = vpop.eup %2421 }
 0x538   :  { %2136 = vmatpush3.msra.mxu0 %v2420_v50  ;;  %v2424_v52 = vpop.eup %2423 }
 0x539   :  { %2137 = vmatprep.subr.mxu0 %v2422_v51 }
 0x53a   :  { %2138 = vmatpush3.msra.mxu0 %v2422_v51 }
 0x53b   :  { %2139 = vmatprep.subr.mxu0 %v2424_v52 }
 0x53c   :  { %2140 = vmatpush3.msra.mxu0 %v2424_v52 }
 0x53d   :  { %2142 = vmatmul.mubr.msk.f32.vlgmr.msra.gmra.mxu0 %vm198_vm0, %v2684_v32 }
 0x53e   :  { %2144 = vmatprep.mubr.msk.f32.mxu0 %vm198_vm0, %v2686_v33 }
 0x541   :  { %2145 = vmatmul.mubr.msk.f32.gmra.mxu0 %vm198_vm0, %v2692_v34 }
 0x542   :  { %2193 = vmatprep.mubr.msk.f32.mxu0 %vm198_vm0, %v2680_v31 }
 0x5fd   :  { %v2143_v53 = vpop.f32.mrf.mxu0 }
 0x5ff   :  { %v811_v54 = vpop.f32.mrf.mxu0 }
 0x600   :  { %2179 = vmatprep.mubr.f32.mxu1 %v811_v54 }
 0x601   :  { %v2146_v55 = vpop.f32.mrf.mxu0  ;;  %2180 = vmatmul.mubr.f32.vlgmr.msra.gmra.mxu1 %v2143_v53 }
 0x603   :  { %v821_v56 = vpop.f32.mrf.mxu0 }
 0x604   :  { %2182 = vmatprep.mubr.f32.mxu1 %v821_v56 }
 0x605   :  { %2183 = vmatmul.mubr.f32.gmra.mxu1 %v2146_v55 }
 0x606   :  { %2245 = vmatprep.mubr.msk.f32.mxu1 %vm198_vm0, %v2680_v31 }
 0x6c1   :  { %v2181_v57 = vpop.f32.mrf.mxu1 }
 0x6c2   :  { %v916_v62 = vadd.f32 %v2181_v57, %v2723_v41 }
 0x6c3   :  { %v896_v58 = vpop.f32.mrf.mxu1 }
 0x6c4   :  { %v915_v0 = vadd.f32 %v896_v58, %v2725_v42 }
 0x6c5   :  { %v2184_v59 = vpop.f32.mrf.mxu1 }
 0x6c6   :  { %v918_v60 = vadd.f32 %v2184_v59, %v2727_v43 }
 0x6c7   :  { %v906_v61 = vpop.f32.mrf.mxu1 }
 0x6c8   :  { %2425 = vtanh.f32 %v918_v60  ;;  %v917_v63 = vadd.f32 %v906_v61, %v2729_v44 }
 0x6ca   :  { %2427 = vtanh.f32 %v917_v63 }
 0x6cb   :  { %2429 = vtanh.f32 %v916_v62 }
 0x6cc   :  { %2431 = vtanh.f32 %v915_v0 }
 0x6d5   :  { %v2426_v1 = vpop.eup %2425 }
 0x6d6   :  { %2185 = vmatprep.subr.mxu0 %v2426_v1 }
 0x6d7   :  { %v2428_v2 = vpop.eup %2427  ;;  %2186 = vmatpush3.msra.mxu0 %v2426_v1 }
 0x6d8   :  { %2187 = vmatprep.subr.mxu0 %v2428_v2  ;;  %v2430_v3 = vpop.eup %2429 }
 0x6d9   :  { %2188 = vmatpush3.msra.mxu0 %v2428_v2  ;;  %v2432_v4 = vpop.eup %2431  ;;  %v2465_v2 = vld [vmem:[#allocation8 + $0x78] sm:$0xff] }
 0x6da   :  { %2189 = vmatprep.subr.mxu0 %v2430_v3 }
 0x6db   :  { %2190 = vmatpush3.msra.mxu0 %v2430_v3  ;;  %v2466_v3 = vld [vmem:[#allocation8 + $0x70] sm:$0xff] }
 0x6dc   :  { %2191 = vmatprep.subr.mxu0 %v2432_v4 }
 0x6dd   :  { %2192 = vmatpush3.msra.mxu0 %v2432_v4  ;;  %v2467_v4 = vld [vmem:[#allocation8 + $0x68] sm:$0xff] }
 0x6de   :  { %2194 = vmatmul.mubr.msk.f32.vlgmr.msra.gmra.mxu0 %vm198_vm0, %v2684_v32  ;;  %2199 = vmatprep.subr.mxu0 %v2640_v7 }
 0x6df   :  { %2196 = vmatprep.mubr.msk.f32.mxu0 %vm198_vm0, %v2686_v33  ;;  %2200 = vmatpush3.msra.mxu0 %v2640_v7 }
 0x6e0   :  { %2201 = vmatprep.subr.mxu0 %v2642_v8 }
 0x6e1   :  { %2202 = vmatpush3.msra.mxu0 %v2642_v8 }
 0x6e2   :  { %2197 = vmatmul.mubr.msk.f32.gmra.mxu0 %vm198_vm0, %v2692_v34  ;;  %2203 = vmatprep.subr.mxu0 %v2646_v10 }
 0x6e3   :  { %2204 = vmatpush3.msra.mxu0 %v2646_v10 }
 0x6e4   :  { %2205 = vmatprep.subr.mxu0 %v2650_v12 }
 0x6e5   :  { %2206 = vmatpush3.msra.mxu0 %v2650_v12 }
 0x6e6   :  { %2207 = vmatprep.subr.mxu0 %v2654_v14 }
 0x6e7   :  { %2208 = vmatpush3.msra.mxu0 %v2654_v14 }
 0x6e8   :  { %2209 = vmatprep.subr.mxu0 %v2658_v16 }
 0x6e9   :  { %2210 = vmatpush3.msra.mxu0 %v2658_v16 }
 0x6ea   :  { %2211 = vmatprep.subr.mxu0 %v2662_v18 }
 0x6eb   :  { %2212 = vmatpush3.msra.mxu0 %v2662_v18 }
 0x6ec   :  { %2213 = vmatprep.subr.mxu0 %v2666_v20 }
 0x6ed   :  { %2214 = vmatpush3.msra.mxu0 %v2666_v20 }
 0x6ee   :  { %2215 = vmatprep.subr.mxu0 %v2670_v22 }
 0x6ef   :  { %2216 = vmatpush3.msra.mxu0 %v2670_v22 }
 0x6f0   :  { %2217 = vmatprep.subr.mxu0 %v2674_v24 }
 0x6f1   :  { %2218 = vmatpush3.msra.mxu0 %v2674_v24 }
 0x6f2   :  { %2219 = vmatprep.subr.mxu0 %v2698_v35 }
 0x6f3   :  { %2220 = vmatpush3.msra.mxu0 %v2698_v35 }
 0x6f4   :  { %2221 = vmatprep.subr.mxu0 %v2702_v36 }
 0x6f5   :  { %2222 = vmatpush3.msra.mxu0 %v2702_v36 }
 0x6f6   :  { %2223 = vmatprep.subr.mxu0 %v2706_v37 }
 0x6f7   :  { %2224 = vmatpush3.msra.mxu0 %v2706_v37 }
 0x6f8   :  { %2225 = vmatprep.subr.mxu0 %v2710_v38 }
 0x6f9   :  { %2226 = vmatpush3.msra.mxu0 %v2710_v38 }
 0x6fa   :  { %2227 = vmatprep.subr.mxu0 %v2714_v39 }
 0x6fb   :  { %2228 = vmatpush3.msra.mxu0 %v2714_v39 }
 0x6fc   :  { %2229 = vmatprep.subr.mxu0 %v2718_v40 }
 0x6fd   :  { %2230 = vmatpush3.msra.mxu0 %v2718_v40 }
 0x79e   :  { %v2195_v5 = vpop.f32.mrf.mxu0 }
 0x7a0   :  { %v989_v6 = vpop.f32.mrf.mxu0 }
 0x7a1   :  { %2231 = vmatprep.mubr.f32.mxu0 %v989_v6  ;;  %v2469_v6 = vld [vmem:[#allocation8 + $0x58] sm:$0xff] }
 0x7a2   :  { %v2198_v9 = vpop.f32.mrf.mxu0  ;;  %2232 = vmatmul.mubr.f32.vlgmr.msra.gmra.mxu0 %v2195_v5  ;;  %v2468_v5 = vld [vmem:[#allocation8 + $0x60] sm:$0xff] }
 0x7a4   :  { %v999_v11 = vpop.f32.mrf.mxu0 }
 0x7a5   :  { %2234 = vmatprep.mubr.f32.mxu0 %v999_v11  ;;  %v2473_v11 = vld [vmem:[#allocation8 + $0x38] sm:$0xff] }
 0x7a6   :  { %2235 = vmatmul.mubr.f32.gmra.mxu0 %v2198_v9  ;;  %v2472_v9 = vld [vmem:[#allocation8 + $0x40] sm:$0xff] }
 0x7a7   :  { %2297 = vmatprep.mubr.msk.f32.mxu0 %vm198_vm0, %v2680_v31 }
 0x862   :  { %v2233_v13 = vpop.f32.mrf.mxu0 }
 0x863   :  { %v1094_v23 = vadd.f32 %v2233_v13, %v2723_v41 }
 0x864   :  { %v1074_v15 = vpop.f32.mrf.mxu0 }
 0x865   :  { %v1093_v26 = vadd.f32 %v1074_v15, %v2725_v42 }
 0x866   :  { %v2236_v17 = vpop.f32.mrf.mxu0 }
 0x867   :  { %v1096_v19 = vadd.f32 %v2236_v17, %v2727_v43 }
 0x868   :  { %v1084_v21 = vpop.f32.mrf.mxu0 }
 0x869   :  { %2433 = vtanh.f32 %v1096_v19  ;;  %v1095_v25 = vadd.f32 %v1084_v21, %v2729_v44 }
 0x86b   :  { %2435 = vtanh.f32 %v1095_v25 }
 0x86c   :  { %2437 = vtanh.f32 %v1094_v23 }
 0x86d   :  { %2439 = vtanh.f32 %v1093_v26 }
 0x876   :  { %v2434_v27 = vpop.eup %2433 }
 0x877   :  { %2237 = vmatprep.subr.mxu1 %v2434_v27 }
 0x878   :  { %v2436_v28 = vpop.eup %2435  ;;  %2238 = vmatpush3.msra.mxu1 %v2434_v27 }
 0x879   :  { %2239 = vmatprep.subr.mxu1 %v2436_v28  ;;  %v2438_v29 = vpop.eup %2437 }
 0x87a   :  { %2240 = vmatpush3.msra.mxu1 %v2436_v28  ;;  %v2440_v30 = vpop.eup %2439 }
 0x87b   :  { %2241 = vmatprep.subr.mxu1 %v2438_v29 }
 0x87c   :  { %2242 = vmatpush3.msra.mxu1 %v2438_v29 }
 0x87d   :  { %2243 = vmatprep.subr.mxu1 %v2440_v30 }
 0x87e   :  { %2244 = vmatpush3.msra.mxu1 %v2440_v30 }
 0x87f   :  { %2246 = vmatmul.mubr.msk.f32.vlgmr.msra.gmra.mxu1 %vm198_vm0, %v2684_v32  ;;  %2251 = vmatprep.subr.mxu1 %v2640_v7 }
 0x880   :  { %2248 = vmatprep.mubr.msk.f32.mxu1 %vm198_vm0, %v2686_v33  ;;  %2252 = vmatpush3.msra.mxu1 %v2640_v7 }
 0x881   :  { %2253 = vmatprep.subr.mxu1 %v2642_v8 }
 0x882   :  { %2254 = vmatpush3.msra.mxu1 %v2642_v8 }
 0x883   :  { %2249 = vmatmul.mubr.msk.f32.gmra.mxu1 %vm198_vm0, %v2692_v34  ;;  %2255 = vmatprep.subr.mxu1 %v2646_v10 }
 0x884   :  { %2256 = vmatpush3.msra.mxu1 %v2646_v10 }
 0x885   :  { %2257 = vmatprep.subr.mxu1 %v2650_v12 }
 0x886   :  { %2258 = vmatpush3.msra.mxu1 %v2650_v12 }
 0x887   :  { %2259 = vmatprep.subr.mxu1 %v2654_v14 }
 0x888   :  { %2260 = vmatpush3.msra.mxu1 %v2654_v14 }
 0x889   :  { %2261 = vmatprep.subr.mxu1 %v2658_v16 }
 0x88a   :  { %2262 = vmatpush3.msra.mxu1 %v2658_v16 }
 0x88b   :  { %2263 = vmatprep.subr.mxu1 %v2662_v18 }
 0x88c   :  { %2264 = vmatpush3.msra.mxu1 %v2662_v18 }
 0x88d   :  { %2265 = vmatprep.subr.mxu1 %v2666_v20 }
 0x88e   :  { %2266 = vmatpush3.msra.mxu1 %v2666_v20 }
 0x88f   :  { %2267 = vmatprep.subr.mxu1 %v2670_v22 }
 0x890   :  { %2268 = vmatpush3.msra.mxu1 %v2670_v22 }
 0x891   :  { %2269 = vmatprep.subr.mxu1 %v2674_v24 }
 0x892   :  { %2270 = vmatpush3.msra.mxu1 %v2674_v24 }
 0x893   :  { %2271 = vmatprep.subr.mxu1 %v2698_v35 }
 0x894   :  { %2272 = vmatpush3.msra.mxu1 %v2698_v35 }
 0x895   :  { %2273 = vmatprep.subr.mxu1 %v2702_v36 }
 0x896   :  { %2274 = vmatpush3.msra.mxu1 %v2702_v36 }
 0x897   :  { %2275 = vmatprep.subr.mxu1 %v2706_v37 }
 0x898   :  { %2276 = vmatpush3.msra.mxu1 %v2706_v37 }
 0x899   :  { %2277 = vmatprep.subr.mxu1 %v2710_v38 }
 0x89a   :  { %2278 = vmatpush3.msra.mxu1 %v2710_v38 }
 0x89b   :  { %2279 = vmatprep.subr.mxu1 %v2714_v39 }
 0x89c   :  { %2280 = vmatpush3.msra.mxu1 %v2714_v39 }
 0x89d   :  { %2281 = vmatprep.subr.mxu1 %v2718_v40 }
 0x89e   :  { %2282 = vmatpush3.msra.mxu1 %v2718_v40 }
 0x93f   :  { %v2247_v45 = vpop.f32.mrf.mxu1 }
 0x941   :  { %v1167_v46 = vpop.f32.mrf.mxu1 }
 0x942   :  { %2283 = vmatprep.mubr.f32.mxu1 %v1167_v46 }
 0x943   :  { %v2250_v47 = vpop.f32.mrf.mxu1  ;;  %2284 = vmatmul.mubr.f32.vlgmr.msra.gmra.mxu1 %v2247_v45 }
 0x945   :  { %v1177_v48 = vpop.f32.mrf.mxu1 }
 0x946   :  { %2286 = vmatprep.mubr.f32.mxu1 %v1177_v48 }
 0x947   :  { %2287 = vmatmul.mubr.f32.gmra.mxu1 %v2250_v47 }
 0x948   :  { %2349 = vmatprep.mubr.msk.f32.mxu1 %vm198_vm0, %v2680_v31 }
 0xa03   :  { %v2285_v49 = vpop.f32.mrf.mxu1 }
 0xa04   :  { %v1272_v54 = vadd.f32 %v2285_v49, %v2723_v41 }
 0xa05   :  { %v1252_v50 = vpop.f32.mrf.mxu1 }
 0xa06   :  { %v1271_v56 = vadd.f32 %v1252_v50, %v2725_v42 }
 0xa07   :  { %v2288_v51 = vpop.f32.mrf.mxu1 }
 0xa08   :  { %v1274_v52 = vadd.f32 %v2288_v51, %v2727_v43 }
 0xa09   :  { %v1262_v53 = vpop.f32.mrf.mxu1 }
 0xa0a   :  { %2441 = vtanh.f32 %v1274_v52  ;;  %v1273_v55 = vadd.f32 %v1262_v53, %v2729_v44 }
 0xa0c   :  { %2443 = vtanh.f32 %v1273_v55 }
 0xa0d   :  { %2445 = vtanh.f32 %v1272_v54 }
 0xa0e   :  { %2447 = vtanh.f32 %v1271_v56 }
 0xa17   :  { %v2442_v57 = vpop.eup %2441 }
 0xa18   :  { %2289 = vmatprep.subr.mxu0 %v2442_v57 }
 0xa19   :  { %v2444_v58 = vpop.eup %2443  ;;  %2290 = vmatpush3.msra.mxu0 %v2442_v57 }
 0xa1a   :  { %2291 = vmatprep.subr.mxu0 %v2444_v58  ;;  %v2446_v31 = vpop.eup %2445 }
 0xa1b   :  { %2292 = vmatpush3.msra.mxu0 %v2444_v58  ;;  %v2448_v59 = vpop.eup %2447 }
 0xa1c   :  { %2293 = vmatprep.subr.mxu0 %v2446_v31 }
 0xa1d   :  { %2294 = vmatpush3.msra.mxu0 %v2446_v31 }
 0xa1e   :  { %2295 = vmatprep.subr.mxu0 %v2448_v59 }
 0xa1f   :  { %2296 = vmatpush3.msra.mxu0 %v2448_v59 }
 0xa20   :  { %2298 = vmatmul.mubr.msk.f32.vlgmr.msra.gmra.mxu0 %vm198_vm0, %v2684_v32  ;;  %2303 = vmatprep.subr.mxu0 %v2640_v7 }
 0xa21   :  { %2300 = vmatprep.mubr.msk.f32.mxu0 %vm198_vm0, %v2686_v33  ;;  %2304 = vmatpush3.msra.mxu0 %v2640_v7 }
 0xa22   :  { %2305 = vmatprep.subr.mxu0 %v2642_v8 }
 0xa23   :  { %2306 = vmatpush3.msra.mxu0 %v2642_v8 }
 0xa24   :  { %2301 = vmatmul.mubr.msk.f32.gmra.mxu0 %vm198_vm0, %v2692_v34  ;;  %2307 = vmatprep.subr.mxu0 %v2646_v10 }
 0xa25   :  { %2308 = vmatpush3.msra.mxu0 %v2646_v10 }
 0xa26   :  { %2309 = vmatprep.subr.mxu0 %v2650_v12 }
 0xa27   :  { %2310 = vmatpush3.msra.mxu0 %v2650_v12 }
 0xa28   :  { %2311 = vmatprep.subr.mxu0 %v2654_v14 }
 0xa29   :  { %2312 = vmatpush3.msra.mxu0 %v2654_v14 }
 0xa2a   :  { %2313 = vmatprep.subr.mxu0 %v2658_v16 }
 0xa2b   :  { %2314 = vmatpush3.msra.mxu0 %v2658_v16 }
 0xa2c   :  { %2315 = vmatprep.subr.mxu0 %v2662_v18 }
 0xa2d   :  { %2316 = vmatpush3.msra.mxu0 %v2662_v18 }
 0xa2e   :  { %2317 = vmatprep.subr.mxu0 %v2666_v20 }
 0xa2f   :  { %2318 = vmatpush3.msra.mxu0 %v2666_v20 }
 0xa30   :  { %2319 = vmatprep.subr.mxu0 %v2670_v22 }
 0xa31   :  { %2320 = vmatpush3.msra.mxu0 %v2670_v22 }
 0xa32   :  { %2321 = vmatprep.subr.mxu0 %v2674_v24 }
 0xa33   :  { %2322 = vmatpush3.msra.mxu0 %v2674_v24 }
 0xa34   :  { %2323 = vmatprep.subr.mxu0 %v2698_v35 }
 0xa35   :  { %2324 = vmatpush3.msra.mxu0 %v2698_v35 }
 0xa36   :  { %2325 = vmatprep.subr.mxu0 %v2702_v36 }
 0xa37   :  { %2326 = vmatpush3.msra.mxu0 %v2702_v36 }
 0xa38   :  { %2327 = vmatprep.subr.mxu0 %v2706_v37 }
 0xa39   :  { %2328 = vmatpush3.msra.mxu0 %v2706_v37 }
 0xa3a   :  { %2329 = vmatprep.subr.mxu0 %v2710_v38 }
 0xa3b   :  { %2330 = vmatpush3.msra.mxu0 %v2710_v38 }
 0xa3c   :  { %2331 = vmatprep.subr.mxu0 %v2714_v39 }
 0xa3d   :  { %2332 = vmatpush3.msra.mxu0 %v2714_v39 }
 0xa3e   :  { %2333 = vmatprep.subr.mxu0 %v2718_v40 }
 0xa3f   :  { %2334 = vmatpush3.msra.mxu0 %v2718_v40 }
 0xae0   :  { %v2299_v7 = vpop.f32.mrf.mxu0 }
 0xae2   :  { %v1345_v8 = vpop.f32.mrf.mxu0 }
 0xae3   :  { %2335 = vmatprep.mubr.f32.mxu0 %v1345_v8 }
 0xae4   :  { %v2302_v10 = vpop.f32.mrf.mxu0  ;;  %2336 = vmatmul.mubr.f32.vlgmr.msra.gmra.mxu0 %v2299_v7 }
 0xae6   :  { %v1355_v12 = vpop.f32.mrf.mxu0 }
 0xae7   :  { %2338 = vmatprep.mubr.f32.mxu0 %v1355_v12 }
 0xae8   :  { %2339 = vmatmul.mubr.f32.gmra.mxu0 %v2302_v10 }
 0xba4   :  { %v2337_v14 = vpop.f32.mrf.mxu0 }
 0xba5   :  { %v1450_v24 = vadd.f32 %v2337_v14, %v2723_v41 }
 0xba6   :  { %v1430_v16 = vpop.f32.mrf.mxu0 }
 0xba7   :  { %v1449_v61 = vadd.f32 %v1430_v16, %v2725_v42 }
 0xba8   :  { %v2340_v18 = vpop.f32.mrf.mxu0 }
 0xba9   :  { %v1452_v20 = vadd.f32 %v2340_v18, %v2727_v43 }
 0xbaa   :  { %v1440_v22 = vpop.f32.mrf.mxu0 }
 0xbab   :  { %2449 = vtanh.f32 %v1452_v20  ;;  %v1451_v60 = vadd.f32 %v1440_v22, %v2729_v44 }
 0xbad   :  { %2451 = vtanh.f32 %v1451_v60 }
 0xbae   :  { %2453 = vtanh.f32 %v1450_v24 }
 0xbaf   :  { %2455 = vtanh.f32 %v1449_v61 }
 0xbb8   :  { %v2450_v62 = vpop.eup %2449 }
 0xbb9   :  { %2341 = vmatprep.subr.mxu1 %v2450_v62 }
 0xbba   :  { %v2452_v63 = vpop.eup %2451  ;;  %2342 = vmatpush3.msra.mxu1 %v2450_v62 }
 0xbbb   :  { %2343 = vmatprep.subr.mxu1 %v2452_v63  ;;  %v2454_v0 = vpop.eup %2453 }
 0xbbc   :  { %2344 = vmatpush3.msra.mxu1 %v2452_v63  ;;  %v2456_v1 = vpop.eup %2455 }
 0xbbd   :  { %2345 = vmatprep.subr.mxu1 %v2454_v0 }
 0xbbe   :  { %2346 = vmatpush3.msra.mxu1 %v2454_v0 }
 0xbbf   :  { %2347 = vmatprep.subr.mxu1 %v2456_v1 }
 0xbc0   :  { %2348 = vmatpush3.msra.mxu1 %v2456_v1 }
 0xbc1   :  { %2350 = vmatmul.mubr.msk.f32.vlgmr.msra.gmra.mxu1 %vm198_vm0, %v2684_v32  ;;  %2355 = vmatprep.subr.mxu1 %v2465_v2  ;;  %v2470_v32 = vld [vmem:[#allocation8 + $0x50] sm:$0xff] }
 0xbc2   :  { %2352 = vmatprep.mubr.msk.f32.mxu1 %vm198_vm0, %v2686_v33  ;;  %2356 = vmatpush3.msra.mxu1 %v2465_v2  ;;  %v2471_v33 = vld [vmem:[#allocation8 + $0x48] sm:$0xff] }
 0xbc3   :  { %2357 = vmatprep.subr.mxu1 %v2466_v3 }
 0xbc4   :  { %2358 = vmatpush3.msra.mxu1 %v2466_v3 }
 0xbc5   :  { %2353 = vmatmul.mubr.msk.f32.gmra.mxu1 %vm198_vm0, %v2692_v34  ;;  %2359 = vmatprep.subr.mxu1 %v2467_v4  ;;  %v2474_v34 = vld [vmem:[#allocation8 + $0x30] sm:$0xff] }
 0xbc6   :  { %2360 = vmatpush3.msra.mxu1 %v2467_v4 }
 0xbc7   :  { %2361 = vmatprep.subr.mxu1 %v2468_v5 }
 0xbc8   :  { %2362 = vmatpush3.msra.mxu1 %v2468_v5 }
 0xbc9   :  { %2363 = vmatprep.subr.mxu1 %v2469_v6 }
 0xbca   :  { %2364 = vmatpush3.msra.mxu1 %v2469_v6 }
 0xbcb   :  { %2365 = vmatprep.subr.mxu1 %v2470_v32 }
 0xbcc   :  { %2366 = vmatpush3.msra.mxu1 %v2470_v32 }
 0xbcd   :  { %2367 = vmatprep.subr.mxu1 %v2471_v33 }
 0xbce   :  { %2368 = vmatpush3.msra.mxu1 %v2471_v33 }
 0xbcf   :  { %2369 = vmatprep.subr.mxu1 %v2472_v9 }
 0xbd0   :  { %2370 = vmatpush3.msra.mxu1 %v2472_v9 }
 0xbd1   :  { %2371 = vmatprep.subr.mxu1 %v2473_v11 }
 0xbd2   :  { %2372 = vmatpush3.msra.mxu1 %v2473_v11 }
 0xbd3   :  { %2373 = vmatprep.subr.mxu1 %v2474_v34 }
 0xbd4   :  { %2374 = vmatpush3.msra.mxu1 %v2474_v34 }
 0xbd5   :  { %2375 = vmatprep.subr.mxu1 %v2698_v35 }
 0xbd6   :  { %2376 = vmatpush3.msra.mxu1 %v2698_v35 }
 0xbd7   :  { %2377 = vmatprep.subr.mxu1 %v2702_v36 }
 0xbd8   :  { %2378 = vmatpush3.msra.mxu1 %v2702_v36 }
 0xbd9   :  { %2379 = vmatprep.subr.mxu1 %v2706_v37 }
 0xbda   :  { %2380 = vmatpush3.msra.mxu1 %v2706_v37 }
 0xbdb   :  { %2381 = vmatprep.subr.mxu1 %v2710_v38 }
 0xbdc   :  { %2382 = vmatpush3.msra.mxu1 %v2710_v38 }
 0xbdd   :  { %2383 = vmatprep.subr.mxu1 %v2714_v39 }
 0xbde   :  { %2384 = vmatpush3.msra.mxu1 %v2714_v39 }
 0xbdf   :  { %2385 = vmatprep.subr.mxu1 %v2718_v40 }
 0xbe0   :  { %2386 = vmatpush3.msra.mxu1 %v2718_v40 }
 0xc81   :  { %v2351_v35 = vpop.f32.mrf.mxu1 }
 0xc83   :  { %v1523_v13 = vpop.f32.mrf.mxu1 }
 0xc84   :  { %2387 = vmatprep.mubr.f32.mxu1 %v1523_v13 }
 0xc85   :  { %v2354_v36 = vpop.f32.mrf.mxu1  ;;  %2388 = vmatmul.mubr.f32.vlgmr.msra.gmra.mxu1 %v2351_v35 }
 0xc87   :  { %v1533_v15 = vpop.f32.mrf.mxu1 }
 0xc88   :  { %2390 = vmatprep.mubr.f32.mxu1 %v1533_v15 }
 0xc89   :  { %2391 = vmatmul.mubr.f32.gmra.mxu1 %v2354_v36 }
 0xd45   :  { %v2389_v37 = vpop.f32.mrf.mxu1 }
 0xd46   :  { %v1628_v17 = vadd.f32 %v2389_v37, %v2723_v41 }
 0xd47   :  { %v1608_v38 = vpop.f32.mrf.mxu1 }
 0xd48   :  { %v1627_v19 = vadd.f32 %v1608_v38, %v2725_v42  ;;  %2457 = vtanh.f32 %v1628_v17 }
 0xd49   :  { %v2392_v39 = vpop.f32.mrf.mxu1 }
 0xd4a   :  { %2459 = vtanh.f32 %v1627_v19  ;;  %v1630_v21 = vadd.f32 %v2392_v39, %v2727_v43 }
 0xd4b   :  { %v1618_v40 = vpop.f32.mrf.mxu1 }
 0xd4c   :  { %v1629_v23 = vadd.f32 %v1618_v40, %v2729_v44  ;;  %2461 = vtanh.f32 %v1630_v21 }
 0xd4e   :  { %2463 = vtanh.f32 %v1629_v23 }
 0xd55   :  { %v2458_v25 = vpop.eup %2457 }
 0xd57   :  { %v2460_v26 = vpop.eup %2459 }
 0xd58   :  { %v1635_v27 = vadd.f32 %v2460_v26, %v2458_v25 }
 0xd59   :  { %v2462_v28 = vpop.eup %2461 }
 0xd5a   :  { %v1636_v29 = vrot.slane %v1635_v27, 4 }
 0xd5b   :  { %v2464_v30 = vpop.eup %2463 }
 0xd5c   :  { %v1637_v41 = vadd.f32 %v1636_v29, %v1635_v27  ;;  %v1642_v45 = vadd.f32 %v2464_v30, %v2462_v28 }
 0xd5e   :  { %v1638_v46 = vrot.slane %v1637_v41, 2  ;;  %v1643_v42 = vrot.slane %v1642_v45, 4 }
 0xd60   :  { %v1639_v47 = vadd.f32 %v1638_v46, %v1637_v41  ;;  %v1644_v48 = vadd.f32 %v1643_v42, %v1642_v45 }
 0xd62   :  { %v1645_v49 = vrot.slane %v1644_v48, 2  ;;  %v1640_v50 = vrot.slane %v1639_v47, 1 }
 0xd64   :  { %v1646_v43 = vadd.f32 %v1645_v49, %v1644_v48  ;;  %v1641_v44 = vadd.f32 %v1640_v50, %v1639_v47 }
 0xd66   :  { %v1647_v51 = vrot.slane %v1646_v43, 1 }
 0xd68   :  { %v1648_v52 = vadd.f32 %v1647_v51, %v1646_v43 }
 0xd6a   :  { %v1652_v53 = vsel %vm1651_vm1, %v1648_v52, %v1641_v44 }
 0xd6b   :  { %1654 = vst [vmem:[#allocation10] sm:$0x3] %v1652_v53 }
 0xd6c   :  { %2566 = shalt.err (!%p2563_p10)
}
 0xd6d   :  { %1664 = dma.vmem_to_hbm [thread:$0]  %s1662_s3, 32, %s3027_s4, [#allocation4]  }
 0xd6e   :  { %2581 = dma.done.wait [#allocation4], 32  }
 0xd6f   :  { %2582 = vsyncadd [#allocation4], 4294967264 }
 0xd70   :  { %1668 = vsyncpa [#allocation3], 1 }
 0xd71   :  { %1669 = vsyncpa [#allocation6], 1 }
 0xd72   :  { %1670 = vsyncpa [#allocation9], 1 }
 0xd73   :  { %1671 = vsyncpa [#allocation4], 1 }

</bundles_post_ra>
